<compile_context>
chip_gen: v7x
topology: tpu7x:2x2x1
jax: 0.10.0
libtpu: 0.0.40
codegen_flags: <defaults>
</compile_context>

<pallas_src>
import functools
import math

import jax
import jax.numpy as jnp
from jax import lax
from jax.experimental import pallas as pl
from jax.experimental.pallas import tpu as pltpu

LANE = 128        # output-channel tile width (lane-dense stores / MXU N)
SUB_ROWS = 128    # output pixels per matmul sub-tile (MXU M)
TM_MAX = 512      # max output pixels per grid step (amortizes ~0.35us/step overhead)


def _conv_kernel(x_ref, w_ref, b_ref, o_ref, *, kh, stride, wo_p, sub_rows):
    """One grid step = TM output pixels x TN output channels of one batch element.

    x_ref: (1, stride, R, KC)  phase-deinterleaved, kw*C_in-packed image slab (whole
                               image, resident in VMEM; DMA'd once per batch element)
    w_ref: (kh, KC, TN)        per-kh-tap packed weights for one output-channel tile
    b_ref: (1, TN)             bias tile
    o_ref: (1, TM, TN)         lane-dense output tile
    """
    m_tile = pl.program_id(2)
    tm = o_ref.shape[1]
    tn = o_ref.shape[2]
    n_sub = tm // sub_rows

    # Hoisted out of the sub-tile loop: per-tap weight tiles and the bias broadcast.
    w_taps = [w_ref[i] for i in range(kh)]                       # (KC, TN) each
    bias_tile = jnp.broadcast_to(b_ref[...], (sub_rows, tn))     # f32

    def body(sub, carry):
        q0 = pl.multiple_of((m_tile * n_sub + sub) * sub_rows, sub_rows)
        acc = bias_tile                                          # init acc with bias
        for i in range(kh):                                      # static, unrolled taps
            start = pl.multiple_of(q0 + (i // stride) * wo_p, 8)
            xs = x_ref[0, i % stride, pl.ds(start, sub_rows), :]  # (SUB_ROWS, KC)
            acc = acc + jnp.dot(xs, w_taps[i], preferred_element_type=jnp.float32)
        row0 = pl.multiple_of(sub * sub_rows, sub_rows)
        o_ref[0, pl.ds(row0, sub_rows), :] = acc.astype(o_ref.dtype)
        return carry

    lax.fori_loop(0, n_sub, body, 0, unroll=True)


@functools.partial(jax.jit, static_argnames=("stride",))
def conv2d_forward(x, w, b, *, stride=1):
    """Replicates Conv2d.forward (unfold -> W @ x_unfold + b -> reshape), fused in-kernel.

    x: (B, C_in, H, W) float32; w: (C_out, C_in, kh, kw); b: (C_out,)
    returns: (B, C_out, Ho, Wo) float32
    """
    x = x.astype(jnp.float32)
    w = w.astype(jnp.float32)
    b = b.astype(jnp.float32)
    C_out, C_in, kh, kw = w.shape
    B, _, H, W = x.shape
    Ho = (H - kh) // stride + 1
    Wo = (W - kw) // stride + 1
    KC = kw * C_in

    # ---- tiling ----
    Wo_p = pl.cdiv(Wo, 8) * 8                    # padded output-row stride (sublane aligned)
    M_v = Ho * Wo_p                              # virtual output pixels (no stride overcompute)
    n_m = pl.cdiv(M_v, TM_MAX)
    TM = pl.cdiv(pl.cdiv(M_v, n_m), SUB_ROWS) * SUB_ROWS
    M_pad = n_m * TM
    N_pad = pl.cdiv(max(C_out, 1), LANE) * LANE
    TN = LANE
    n_n = N_pad // TN

    di_max = (kh - 1) // stride                  # max kh-tap row offset within a phase
    H_ph = pl.cdiv(M_pad + di_max * Wo_p, Wo_p)  # image rows needed per phase
    R_slab = H_ph * Wo_p                         # slab rows per phase (multiple of 8)

    # ---- wrapper-side packing: NCHW -> (B, stride, R_slab, kw*C_in) ----
    H_pad = max(H, H_ph * stride)
    W_pad = max(W, (Wo_p - 1) * stride + kw)
    x_nhwc = jnp.pad(x.transpose(0, 2, 3, 1),
                     ((0, 0), (0, H_pad - H), (0, W_pad - W), (0, 0)))
    # kw window packed into the lane dim (lane index = j*C_in + c).
    x_kw = jnp.stack(
        [x_nhwc[:, :, j::stride, :][:, :, :Wo_p, :] for j in range(kw)],
        axis=3).reshape(B, H_pad, Wo_p, KC)
    # kh-direction stride phases deinterleaved -> every in-kernel tap is unit-stride.
    x_pk = jnp.stack(
        [x_kw[:, p::stride][:, :H_ph] for p in range(stride)],
        axis=1).reshape(B, stride, R_slab, KC)

    # Weights: (C_out, C_in, kh, kw) -> (kh, kw*C_in, N_pad), matching the x packing.
    w_pk = jnp.pad(w.transpose(2, 3, 1, 0).reshape(kh, KC, C_out),
                   ((0, 0), (0, 0), (0, N_pad - C_out)))
    b_row = jnp.pad(b, (0, N_pad - C_out)).reshape(1, N_pad)

    # ---- explicit VMEM budget (double-buffered blocks) ----
    kc_lanes = pl.cdiv(KC, LANE) * LANE
    est = 2 * (stride * R_slab * kc_lanes            # resident image slab
               + kh * pl.cdiv(KC, 8) * 8 * TN        # weight tile
               + 8 * TN                              # bias tile
               + TM * TN) * 4                        # output tile
    vmem_limit = int(min(max(est + (4 << 20), 32 << 20), 112 << 20))
    # TODO(synk): for very large images the whole-image slab exceeds VMEM (esp. v7x's
    # 64 MiB) -- strip-tile along H with halo rows or switch the slab to manual DMA.

    kernel = functools.partial(_conv_kernel, kh=kh, stride=stride, wo_p=Wo_p,
                               sub_rows=SUB_ROWS)

    y = pl.pallas_call(
        kernel,
        out_shape=jax.ShapeDtypeStruct((B, M_pad, N_pad), jnp.float32),
        grid_spec=pltpu.PrefetchScalarGridSpec(
            num_scalar_prefetch=0,
            grid=(B, n_n, M_pad // TM),              # M innermost: weights reused across M
            in_specs=[
                # Whole packed image slab; block index constant along (n, m) -> DMA'd
                # exactly once per batch element.
                pl.BlockSpec((1, stride, R_slab, KC), lambda bi, ni, mi: (bi, 0, 0, 0)),
                # Weights / bias tiled along the output-channel axis only.
                pl.BlockSpec((kh, KC, TN), lambda bi, ni, mi: (0, 0, ni)),
                pl.BlockSpec((1, TN), lambda bi, ni, mi: (0, ni)),
            ],
            out_specs=pl.BlockSpec((1, TM, TN), lambda bi, ni, mi: (bi, mi, ni)),
        ),
        compiler_params=pltpu.CompilerParams(
            dimension_semantics=("parallel", "parallel", "parallel"),
            vmem_limit_bytes=vmem_limit),
    )(x_pk, w_pk, b_row)

    # Fold channel slice + Wo slice + NCHW transpose into one epilogue op chain.
    out = (y[:, :Ho * Wo_p, :C_out]
           .reshape(B, Ho, Wo_p, C_out)[:, :, :Wo, :]
           .transpose(0, 3, 1, 2))
    return out


class Conv2dPallas:
    """Mirror of the PyTorch Conv2d module (forward only)."""

    def __init__(self, in_channels, out_channels, kernel_size=(3, 3), stride=1,
                 padding=0, *, key):
        if isinstance(kernel_size, int):
            kernel_size = (kernel_size, kernel_size)
        self.in_channels = in_channels
        self.out_channels = out_channels
        self.k_size = kernel_size
        self.stride = stride
        self.padding = padding  # stored, but (like the reference) unused in forward
        k = 1.0 / (out_channels * kernel_size[0] * kernel_size[1])
        bound = math.sqrt(k)
        kw_, kb_ = jax.random.split(key)
        self.w = jax.random.uniform(
            kw_, (out_channels, in_channels, kernel_size[0], kernel_size[1]),
            jnp.float32, minval=-bound, maxval=bound)
        self.b = jax.random.uniform(
            kb_, (out_channels,), jnp.float32, minval=-bound, maxval=bound)

    def forward(self, x):
        return conv2d_forward(x, self.w, self.b, stride=self.stride)


if __name__ == "__main__":
    key = jax.random.PRNGKey(0)
    k_x, k_p1, k_p2 = jax.random.split(key, 3)

    B, C_in, H, W = 2, 4, 16, 16
    C_out, k_size = 8, (3, 3)
    x = jax.random.normal(k_x, (B, C_in, H, W), dtype=jnp.float32)

    for stride, kparam in ((1, k_p1), (2, k_p2)):
        conv = Conv2dPallas(C_in, C_out, kernel_size=k_size, stride=stride, key=kparam)
        out = jax.block_until_ready(conv.forward(x))

        # Reference (plain JAX/XLA conv) for correctness.
        ref = lax.conv_general_dilated(
            x, conv.w, window_strides=(stride, stride), padding="VALID",
            dimension_numbers=("NCHW", "OIHW", "NCHW"),
        ) + conv.b.reshape(1, C_out, 1, 1)

        Ho = (H - k_size[0]) // stride + 1
        Wo = (W - k_size[1]) // stride + 1
        assert out.shape == (B, C_out, Ho, Wo), (stride, out.shape)
        assert out.dtype == jnp.float32
        err = float(jnp.max(jnp.abs(out - ref)))
        assert err < 1e-4, (stride, err)

    print("KERNEL_OK")
</pallas_src>

<mosaic_0001>
module attributes {stable_mosaic.version = 11 : i64} {
  func.func @_conv_kernel(%arg0: i32, %arg1: i32, %arg2: i32, %arg3: memref<1x1x288x12xf32, #tpu.memory_space<vmem>>, %arg4: memref<3x12x128xf32, #tpu.memory_space<vmem>>, %arg5: memref<1x128xf32, #tpu.memory_space<vmem>>, %arg6: memref<1x256x128xf32, #tpu.memory_space<vmem>>) attributes {dimension_semantics = [#tpu.dimension_semantics<parallel>, #tpu.dimension_semantics<parallel>, #tpu.dimension_semantics<parallel>], iteration_bounds = array<i64: 2, 1, 1>, scalar_prefetch = 0 : i64, scratch_operands = 0 : i64, tpu.core_type = #tpu.core_type<tc>, window_params = [{transform_indices = @transform_0, window_bounds = array<i64: 1, 1, 288, 12>}, {transform_indices = @transform_1, window_bounds = array<i64: 3, 12, 128>}, {transform_indices = @transform_2, window_bounds = array<i64: 1, 128>}, {transform_indices = @transform_3, window_bounds = array<i64: 1, 256, 128>}]} {
    %c0 = arith.constant 0 : index
    %c0_0 = arith.constant 0 : index
    %c0_1 = arith.constant 0 : index
    %0 = vector.load %arg4[%c0, %c0_0, %c0_1] : memref<3x12x128xf32, #tpu.memory_space<vmem>>, vector<1x12x128xf32>
    %1 = vector.shape_cast %0 : vector<1x12x128xf32> to vector<12x128xf32>
    %c1 = arith.constant 1 : index
    %c0_2 = arith.constant 0 : index
    %c0_3 = arith.constant 0 : index
    %2 = vector.load %arg4[%c1, %c0_2, %c0_3] : memref<3x12x128xf32, #tpu.memory_space<vmem>>, vector<1x12x128xf32>
    %3 = vector.shape_cast %2 : vector<1x12x128xf32> to vector<12x128xf32>
    %c2 = arith.constant 2 : index
    %c0_4 = arith.constant 0 : index
    %c0_5 = arith.constant 0 : index
    %4 = vector.load %arg4[%c2, %c0_4, %c0_5] : memref<3x12x128xf32, #tpu.memory_space<vmem>>, vector<1x12x128xf32>
    %5 = vector.shape_cast %4 : vector<1x12x128xf32> to vector<12x128xf32>
    %c0_6 = arith.constant 0 : index
    %c0_7 = arith.constant 0 : index
    %6 = vector.load %arg5[%c0_6, %c0_7] : memref<1x128xf32, #tpu.memory_space<vmem>>, vector<1x128xf32>
    %7 = vector.shape_cast %6 : vector<1x128xf32> to vector<1x128xf32>
    %8 = vector.broadcast %7 : vector<1x128xf32> to vector<128x128xf32>
    %c0_i32 = arith.constant 0 : i32
    %c2_i32 = arith.constant 2 : i32
    %9 = arith.muli %arg2, %c2_i32 : i32
    %10 = arith.addi %9, %c0_i32 : i32
    %c128_i32 = arith.constant 128 : i32
    %11 = arith.muli %10, %c128_i32 : i32
    %12 = tpu.assume_multiple %11, 128 : i32
    %c0_i32_8 = arith.constant 0 : i32
    %13 = arith.addi %12, %c0_i32_8 : i32
    %14 = tpu.assume_multiple %13, 8 : i32
    %c0_9 = arith.constant 0 : index
    %c0_10 = arith.constant 0 : index
    %15 = arith.index_cast %14 : i32 to index
    %c0_11 = arith.constant 0 : index
    %16 = vector.load %arg3[%c0_9, %c0_10, %15, %c0_11] : memref<1x1x288x12xf32, #tpu.memory_space<vmem>>, vector<1x1x128x12xf32>
    %17 = vector.shape_cast %16 : vector<1x1x128x12xf32> to vector<128x12xf32>
    %cst = arith.constant dense<0.000000e+00> : vector<128x128xf32>
    %18 = tpu.matmul %17, %1, %cst {dimension_numbers = #tpu.dot_dimension_numbers<[1], [0], [0], [1], [0, 0, 1, 1], [], []>} : vector<128x12xf32>, vector<12x128xf32>, vector<128x128xf32> -> vector<128x128xf32>
    %19 = arith.addf %8, %18 : vector<128x128xf32>
    %c16_i32 = arith.constant 16 : i32
    %20 = arith.addi %12, %c16_i32 : i32
    %21 = tpu.assume_multiple %20, 8 : i32
    %c0_12 = arith.constant 0 : index
    %c0_13 = arith.constant 0 : index
    %22 = arith.index_cast %21 : i32 to index
    %c0_14 = arith.constant 0 : index
    %23 = vector.load %arg3[%c0_12, %c0_13, %22, %c0_14] : memref<1x1x288x12xf32, #tpu.memory_space<vmem>>, vector<1x1x128x12xf32>
    %24 = vector.shape_cast %23 : vector<1x1x128x12xf32> to vector<128x12xf32>
    %cst_15 = arith.constant dense<0.000000e+00> : vector<128x128xf32>
    %25 = tpu.matmul %24, %3, %cst_15 {dimension_numbers = #tpu.dot_dimension_numbers<[1], [0], [0], [1], [0, 0, 1, 1], [], []>} : vector<128x12xf32>, vector<12x128xf32>, vector<128x128xf32> -> vector<128x128xf32>
    %26 = arith.addf %19, %25 : vector<128x128xf32>
    %c32_i32 = arith.constant 32 : i32
    %27 = arith.addi %12, %c32_i32 : i32
    %28 = tpu.assume_multiple %27, 8 : i32
    %c0_16 = arith.constant 0 : index
    %c0_17 = arith.constant 0 : index
    %29 = arith.index_cast %28 : i32 to index
    %c0_18 = arith.constant 0 : index
    %30 = vector.load %arg3[%c0_16, %c0_17, %29, %c0_18] : memref<1x1x288x12xf32, #tpu.memory_space<vmem>>, vector<1x1x128x12xf32>
    %31 = vector.shape_cast %30 : vector<1x1x128x12xf32> to vector<128x12xf32>
    %cst_19 = arith.constant dense<0.000000e+00> : vector<128x128xf32>
    %32 = tpu.matmul %31, %5, %cst_19 {dimension_numbers = #tpu.dot_dimension_numbers<[1], [0], [0], [1], [0, 0, 1, 1], [], []>} : vector<128x12xf32>, vector<12x128xf32>, vector<128x128xf32> -> vector<128x128xf32>
    %33 = arith.addf %26, %32 : vector<128x128xf32>
    %c128_i32_20 = arith.constant 128 : i32
    %34 = arith.muli %c0_i32, %c128_i32_20 : i32
    %35 = tpu.assume_multiple %34, 128 : i32
    %c0_21 = arith.constant 0 : index
    %36 = arith.index_cast %35 : i32 to index
    %c0_22 = arith.constant 0 : index
    %37 = vector.load %arg6[%c0_21, %36, %c0_22] : memref<1x256x128xf32, #tpu.memory_space<vmem>>, vector<1x128x128xf32>
    %38 = vector.shape_cast %37 : vector<1x128x128xf32> to vector<128x128xf32>
    %39 = vector.shape_cast %33 : vector<128x128xf32> to vector<1x128x128xf32>
    tpu.vector_store %arg6[%c0_21, %36, %c0_22], %39 {strides = array<i32>} : memref<1x256x128xf32, #tpu.memory_space<vmem>>, vector<1x128x128xf32>,
    %c1_i32 = arith.constant 1 : i32
    %c2_i32_23 = arith.constant 2 : i32
    %40 = arith.muli %arg2, %c2_i32_23 : i32
    %41 = arith.addi %40, %c1_i32 : i32
    %c128_i32_24 = arith.constant 128 : i32
    %42 = arith.muli %41, %c128_i32_24 : i32
    %43 = tpu.assume_multiple %42, 128 : i32
    %c0_i32_25 = arith.constant 0 : i32
    %44 = arith.addi %43, %c0_i32_25 : i32
    %45 = tpu.assume_multiple %44, 8 : i32
    %c0_26 = arith.constant 0 : index
    %c0_27 = arith.constant 0 : index
    %46 = arith.index_cast %45 : i32 to index
    %c0_28 = arith.constant 0 : index
    %47 = vector.load %arg3[%c0_26, %c0_27, %46, %c0_28] : memref<1x1x288x12xf32, #tpu.memory_space<vmem>>, vector<1x1x128x12xf32>
    %48 = vector.shape_cast %47 : vector<1x1x128x12xf32> to vector<128x12xf32>
    %cst_29 = arith.constant dense<0.000000e+00> : vector<128x128xf32>
    %49 = tpu.matmul %48, %1, %cst_29 {dimension_numbers = #tpu.dot_dimension_numbers<[1], [0], [0], [1], [0, 0, 1, 1], [], []>} : vector<128x12xf32>, vector<12x128xf32>, vector<128x128xf32> -> vector<128x128xf32>
    %50 = arith.addf %8, %49 : vector<128x128xf32>
    %c16_i32_30 = arith.constant 16 : i32
    %51 = arith.addi %43, %c16_i32_30 : i32
    %52 = tpu.assume_multiple %51, 8 : i32
    %c0_31 = arith.constant 0 : index
    %c0_32 = arith.constant 0 : index
    %53 = arith.index_cast %52 : i32 to index
    %c0_33 = arith.constant 0 : index
    %54 = vector.load %arg3[%c0_31, %c0_32, %53, %c0_33] : memref<1x1x288x12xf32, #tpu.memory_space<vmem>>, vector<1x1x128x12xf32>
    %55 = vector.shape_cast %54 : vector<1x1x128x12xf32> to vector<128x12xf32>
    %cst_34 = arith.constant dense<0.000000e+00> : vector<128x128xf32>
    %56 = tpu.matmul %55, %3, %cst_34 {dimension_numbers = #tpu.dot_dimension_numbers<[1], [0], [0], [1], [0, 0, 1, 1], [], []>} : vector<128x12xf32>, vector<12x128xf32>, vector<128x128xf32> -> vector<128x128xf32>
    %57 = arith.addf %50, %56 : vector<128x128xf32>
    %c32_i32_35 = arith.constant 32 : i32
    %58 = arith.addi %43, %c32_i32_35 : i32
    %59 = tpu.assume_multiple %58, 8 : i32
    %c0_36 = arith.constant 0 : index
    %c0_37 = arith.constant 0 : index
    %60 = arith.index_cast %59 : i32 to index
    %c0_38 = arith.constant 0 : index
    %61 = vector.load %arg3[%c0_36, %c0_37, %60, %c0_38] : memref<1x1x288x12xf32, #tpu.memory_space<vmem>>, vector<1x1x128x12xf32>
    %62 = vector.shape_cast %61 : vector<1x1x128x12xf32> to vector<128x12xf32>
    %cst_39 = arith.constant dense<0.000000e+00> : vector<128x128xf32>
    %63 = tpu.matmul %62, %5, %cst_39 {dimension_numbers = #tpu.dot_dimension_numbers<[1], [0], [0], [1], [0, 0, 1, 1], [], []>} : vector<128x12xf32>, vector<12x128xf32>, vector<128x128xf32> -> vector<128x128xf32>
    %64 = arith.addf %57, %63 : vector<128x128xf32>
    %c128_i32_40 = arith.constant 128 : i32
    %65 = arith.muli %c1_i32, %c128_i32_40 : i32
    %66 = tpu.assume_multiple %65, 128 : i32
    %c0_41 = arith.constant 0 : index
    %67 = arith.index_cast %66 : i32 to index
    %c0_42 = arith.constant 0 : index
    %68 = vector.load %arg6[%c0_41, %67, %c0_42] : memref<1x256x128xf32, #tpu.memory_space<vmem>>, vector<1x128x128xf32>
    %69 = vector.shape_cast %68 : vector<1x128x128xf32> to vector<128x128xf32>
    %70 = vector.shape_cast %64 : vector<128x128xf32> to vector<1x128x128xf32>
    tpu.vector_store %arg6[%c0_41, %67, %c0_42], %70 {strides = array<i32>} : memref<1x256x128xf32, #tpu.memory_space<vmem>>, vector<1x128x128xf32>,
    %c2_i32_43 = arith.constant 2 : i32
    return
  }
  func.func @transform_0(%arg0: i32, %arg1: i32, %arg2: i32) -> (i32, i32, i32, i32) {
    %c0_i32 = arith.constant 0 : i32
    %c0_i32_0 = arith.constant 0 : i32
    %c0_i32_1 = arith.constant 0 : i32
    %c0_i32_2 = arith.constant 0 : i32
    return %arg0, %c0_i32, %c0_i32_0, %c0_i32_1 : i32, i32, i32, i32
  }
  func.func @transform_1(%arg0: i32, %arg1: i32, %arg2: i32) -> (i32, i32, i32) {
    %c0_i32 = arith.constant 0 : i32
    %c0_i32_0 = arith.constant 0 : i32
    %c0_i32_1 = arith.constant 0 : i32
    return %c0_i32, %c0_i32_0, %arg1 : i32, i32, i32
  }
  func.func @transform_2(%arg0: i32, %arg1: i32, %arg2: i32) -> (i32, i32) {
    %c0_i32 = arith.constant 0 : i32
    %c0_i32_0 = arith.constant 0 : i32
    return %c0_i32, %arg1 : i32, i32
  }
  func.func @transform_3(%arg0: i32, %arg1: i32, %arg2: i32) -> (i32, i32, i32) {
    %c0_i32 = arith.constant 0 : i32
    return %arg0, %arg2, %arg1 : i32, i32, i32
  }
}

</mosaic_0001>

<bundles_post_ra>
// kernel: conv2d_forward.1
= control target key start
LH: loop header
LB: loop body
LE: loop exit
PB: predicated region body
PF: predicated region fallthrough
CT: control target
= control target key end

     0   :  { %s2499_s12 = smov 0   ;;  %s2501_s13 = smov 0   ;;  %s2927_s0 = inlined_call_operand.vmem [shape: f32[2,1,288,12], index: 0, kind: input, shape index: {}]   ;;  %s2928_s1 = inlined_call_operand.vmem [shape: f32[3,12,128], index: 1, kind: input, shape index: {}]   ;;  %s2929_s2 = inlined_call_operand.vmem [shape: f32[1,128], index: 2, kind: input, shape index: {}]   ;;  %s2930_s3 = inlined_call_operand.vmem [shape: f32[2,256,128], index: 3, kind: output, shape index: {}]  }
   0x1   :  { %s2503_s14 = smov 0  }
   0x2 LB: > { %s32_s15 = sadd.s32 1, %s2472_s13  ;;  %p1810_p0 = scmp.ge.s32.totalorder %s2476_s14, 1  ;;  %s2476_s14 = sphi %s2503_s14, %s13_s14   ;;  %s2472_s13 = sphi %s2501_s13, %s2934_s13   ;;  %s2468_s12 = sphi %s2499_s12, %s2933_s12  }
   0x3   : > { %p34_p1 = scmp.ge.s32.totalorder %s32_s15, 2  ;;  %p177_p2 = scmp.lt.s32.totalorder %s2476_s14, 3 }
   0x5   : > { %s2936_s15 = smov (%p34_p1, %s32_s15), 0  ;;  %p178_p3 = pnand %p1810_p0, %p177_p2 }
   0x6   : > { %v240_v0 = vld [vmem:[%s2928_s1] sm:$0xff] (!%p178_p3)  ;;  %v241_v1 = vld [vmem:[%s2928_s1 + $0x8] sm:$0xf] (!%p178_p3)  ;;  %vm322_vm0 = vcmask (!%p178_p3), 1043456   ;;  %p215_p4 = scmp.lt.s32.totalorder (!%p178_p3), %s2468_s12, 1  ;;  %vm2478_vm1 = vmmov (!%p178_p3), 1  }
   0x7   : > { %181 = sbr.rel (%p178_p3) target bundleno = 329 (0x149), region = 32  ;;  %v2296_v2 = vpack.c.bf16 (!%p178_p3), %v241_v1, %v240_v0  ;;  %vm2523_vm2 = vmpackc.low (!%p178_p3), %vm322_vm0, %vm2478_vm1  ;;  %v1814_v4 = vld [vmem:[%s2928_s1 + $0x10] sm:$0xff] (!%p178_p3)  ;;  %v1815_v5 = vld [vmem:[%s2928_s1 + $0x18] sm:$0xf] (!%p178_p3)  ;;  %vm273_vm3 = vcmask (!%p178_p3), 97280  }
   0x8   : > { %v2302_v6 = vpack.c.bf16 (!%p178_p3), %v1815_v5, %v1814_v4  ;;  %v1816_v7 = vld [vmem:[%s2928_s1 + $0x20] sm:$0xff] (!%p178_p3)  ;;  %v1817_v8 = vld [vmem:[%s2928_s1 + $0x28] sm:$0xf] (!%p178_p3) }
   0x9   : > { %2298 = vmatprep.subr.msk.bf16.mxu0 (!%p178_p3), %vm2523_vm2, %v2296_v2  ;;  %2316 = vmatprep.subr.msk.bf16.mxu1 (!%p178_p3), %vm2523_vm2, %v2296_v2  ;;  %v2576_v15 = vpack.c.bf16 (!%p178_p3), %v1817_v8, %v1816_v7  ;;  %v2847_v46 = vld [vmem:[%s2929_s2] ss:$0 sm:$0xff] (!%p178_p3) }
   0xa   : > { %2301 = vmatpush3.bf16.msk.msra.mxu0 (!%p178_p3), %vm2523_vm2, %v2296_v2  ;;  %2319 = vmatpush3.bf16.msk.msra.mxu1 (!%p178_p3), %vm2523_vm2, %v2296_v2 }
   0xb   : > { %2304 = vmatprep.subr.msk.bf16.mxu0 (!%p178_p3), %vm2523_vm2, %v2302_v6  ;;  %2322 = vmatprep.subr.msk.bf16.mxu1 (!%p178_p3), %vm2523_vm2, %v2302_v6 }
   0xe   : > { %s2938_s12 = smov (!%p215_p4, %s2468_s12), 1 }
   0xf   : > { %s2428_s24 = smul.u32 288, %s2938_s12  ;;  %s2019_s5 = sshll.u32 %s2938_s12, 8 }
  0x10   : > { %s2852_s10 = scalar_lea.vmem %s2930_s3, %s2019_s5 }
  0x11   : > { %s2557_s4 = scalar_lea.vmem %s2927_s0, %s2428_s24 }
  0x12   : > { %v257_v9 = vld [vmem:[%s2557_s4] sm:$0xff]  ;;  %v258_v11 = vld [vmem:[%s2557_s4 + $0x8] sm:$0xff]  ;;  %v2571_v13 = vld [vmem:[%s2557_s4 + $0x10] sm:$0xff] }
  0x13   : > { %v2561_v10 = vld [vmem:[%s2557_s4 + $0x80] sm:$0xff]  ;;  %2132 = vmatprep.mubr.msk.f32.mxu0 %vm273_vm3, %v257_v9  ;;  %v2568_v12 = vld [vmem:[%s2557_s4 + $0x88] sm:$0xff]  ;;  %v2574_v14 = vld [vmem:[%s2557_s4 + $0x90] sm:$0xff] }
  0x14   : > { %2216 = vmatprep.mubr.msk.f32.mxu1 %vm273_vm3, %v2561_v10  ;;  %2133 = vmatmul.mubr.msk.f32.vlgmr.msra.gmra.mrb[0].mxu0 %vm273_vm3, %v258_v11  ;;  %v260_v16 = vld [vmem:[%s2557_s4 + $0x18] sm:$0xff]  ;;  %v2594_v18 = vld [vmem:[%s2557_s4 + $0x20] sm:$0xff]  ;;  %v2613_v20 = vld [vmem:[%s2557_s4 + $0x28] sm:$0xff] }
  0x15   : > { %2217 = vmatmul.mubr.msk.f32.vlgmr.msra.gmra.mrb[0].mxu1 %vm273_vm3, %v2568_v12  ;;  %2307 = vmatpush3.bf16.msk.msra.mxu0 %vm2523_vm2, %v2302_v6  ;;  %v2587_v17 = vld [vmem:[%s2557_s4 + $0x98] sm:$0xff]  ;;  %v2597_v19 = vld [vmem:[%s2557_s4 + $0xa0] sm:$0xff]  ;;  %v2616_v21 = vld [vmem:[%s2557_s4 + $0xa8] sm:$0xff] }
  0x16   : > { %2325 = vmatpush3.bf16.msk.msra.mxu1 %vm2523_vm2, %v2302_v6  ;;  %2135 = vmatprep.mubr.msk.f32.mxu0 %vm273_vm3, %v2571_v13  ;;  %v2619_v22 = vld [vmem:[%s2557_s4 + $0x30] sm:$0xff]  ;;  %v2633_v24 = vld [vmem:[%s2557_s4 + $0x38] sm:$0xff]  ;;  %v2639_v26 = vld [vmem:[%s2557_s4 + $0x40] sm:$0xff] }
  0x17   : > { %2219 = vmatprep.mubr.msk.f32.mxu1 %vm273_vm3, %v2574_v14  ;;  %2310 = vmatprep.subr.msk.bf16.mxu0 %vm2523_vm2, %v2576_v15  ;;  %v2622_v23 = vld [vmem:[%s2557_s4 + $0xb0] sm:$0xff]  ;;  %v2636_v25 = vld [vmem:[%s2557_s4 + $0xb8] sm:$0xff]  ;;  %v2642_v27 = vld [vmem:[%s2557_s4 + $0xc0] sm:$0xff] }
  0x18   : > { %2328 = vmatprep.subr.msk.bf16.mxu1 %vm2523_vm2, %v2576_v15  ;;  %2136 = vmatmul.mubr.msk.f32.gmra.mrb[2].mxu0 %vm273_vm3, %v260_v16  ;;  %v2653_v28 = vld [vmem:[%s2557_s4 + $0x48] sm:$0xff]  ;;  %v2659_v30 = vld [vmem:[%s2557_s4 + $0x50] sm:$0xff]  ;;  %v2673_v32 = vld [vmem:[%s2557_s4 + $0x58] sm:$0xff] }
  0x19   : > { %2220 = vmatmul.mubr.msk.f32.gmra.mrb[2].mxu1 %vm273_vm3, %v2587_v17  ;;  %2138 = vmatprep.mubr.msk.f32.mxu0 %vm273_vm3, %v2594_v18  ;;  %v2656_v29 = vld [vmem:[%s2557_s4 + $0xc8] sm:$0xff]  ;;  %v2662_v31 = vld [vmem:[%s2557_s4 + $0xd0] sm:$0xff]  ;;  %v2676_v33 = vld [vmem:[%s2557_s4 + $0xd8] sm:$0xff] }
  0x1a   : > { %2222 = vmatprep.mubr.msk.f32.mxu1 %vm273_vm3, %v2597_v19  ;;  %v2679_v34 = vld [vmem:[%s2557_s4 + $0x60] sm:$0xff]  ;;  %v2693_v36 = vld [vmem:[%s2557_s4 + $0x68] sm:$0xff]  ;;  %v2699_v38 = vld [vmem:[%s2557_s4 + $0x70] sm:$0xff] }
  0x1b   : > { %v2682_v35 = vld [vmem:[%s2557_s4 + $0xe0] sm:$0xff]  ;;  %v2696_v37 = vld [vmem:[%s2557_s4 + $0xe8] sm:$0xff]  ;;  %v2702_v39 = vld [vmem:[%s2557_s4 + $0xf0] sm:$0xff] }
  0x1c   : > { %2139 = vmatmul.mubr.msk.f32.gmra.mrb[4].mxu0 %vm273_vm3, %v2613_v20  ;;  %v272_v40 = vld [vmem:[%s2557_s4 + $0x78] sm:$0xff]  ;;  %v1949_v42 = vld [vmem:[%s2557_s4 + $0x100] sm:$0xff]  ;;  %v1950_v43 = vld [vmem:[%s2557_s4 + $0x108] sm:$0xff] }
  0x1d   : > { %2223 = vmatmul.mubr.msk.f32.gmra.mrb[4].mxu1 %vm273_vm3, %v2616_v21  ;;  %2141 = vmatprep.mubr.msk.f32.mxu0 %vm273_vm3, %v2619_v22  ;;  %v1917_v41 = vld [vmem:[%s2557_s4 + $0xf8] sm:$0xff]  ;;  %v1982_v44 = vld [vmem:[%s2557_s4 + $0x110] sm:$0xff] }
  0x1e   : > { %2225 = vmatprep.mubr.msk.f32.mxu1 %vm273_vm3, %v2622_v23  ;;  %v1983_v45 = vld [vmem:[%s2557_s4 + $0x118] sm:$0xff] }
  0x20   : > { %2142 = vmatmul.mubr.msk.f32.gmra.mrb[6].mxu0 %vm273_vm3, %v2633_v24 }
  0x21   : > { %2226 = vmatmul.mubr.msk.f32.gmra.mrb[6].mxu1 %vm273_vm3, %v2636_v25  ;;  %2144 = vmatprep.mubr.msk.f32.mxu0 %vm273_vm3, %v2639_v26 }
  0x22   : > { %2228 = vmatprep.mubr.msk.f32.mxu1 %vm273_vm3, %v2642_v27 }
  0x24   : > { %2145 = vmatmul.mubr.msk.f32.gmra.mrb[8].mxu0 %vm273_vm3, %v2653_v28 }
  0x25   : > { %2229 = vmatmul.mubr.msk.f32.gmra.mrb[8].mxu1 %vm273_vm3, %v2656_v29  ;;  %2147 = vmatprep.mubr.msk.f32.mxu0 %vm273_vm3, %v2659_v30 }
  0x26   : > { %2231 = vmatprep.mubr.msk.f32.mxu1 %vm273_vm3, %v2662_v31 }
  0x28   : > { %2148 = vmatmul.mubr.msk.f32.gmra.mrb[10].mxu0 %vm273_vm3, %v2673_v32 }
  0x29   : > { %2232 = vmatmul.mubr.msk.f32.gmra.mrb[10].mxu1 %vm273_vm3, %v2676_v33  ;;  %2150 = vmatprep.mubr.msk.f32.mxu0 %vm273_vm3, %v2679_v34 }
  0x2a   : > { %2234 = vmatprep.mubr.msk.f32.mxu1 %vm273_vm3, %v2682_v35 }
  0x2c   : > { %2151 = vmatmul.mubr.msk.f32.gmra.mrb[12].mxu0 %vm273_vm3, %v2693_v36 }
  0x2d   : > { %2235 = vmatmul.mubr.msk.f32.gmra.mrb[12].mxu1 %vm273_vm3, %v2696_v37  ;;  %2153 = vmatprep.mubr.msk.f32.mxu0 %vm273_vm3, %v2699_v38 }
  0x2e   : > { %2237 = vmatprep.mubr.msk.f32.mxu1 %vm273_vm3, %v2702_v39 }
  0x30   : > { %2154 = vmatmul.mubr.msk.f32.gmra.mrb[14].mxu0 %vm273_vm3, %v272_v40 }
  0x31   : > { %2238 = vmatmul.mubr.msk.f32.gmra.mrb[14].mxu1 %vm273_vm3, %v1917_v41  ;;  %2160 = vmatprep.mubr.msk.f32.mxu0 %vm273_vm3, %v2571_v13 }
  0x32   : > { %2244 = vmatprep.mubr.msk.f32.mxu1 %vm273_vm3, %v2574_v14 }
  0x34   : > { %2161 = vmatmul.mubr.msk.f32.vlgmr.msra.gmra.mrb[0].mxu0 %vm273_vm3, %v260_v16 }
  0x35   : > { %2245 = vmatmul.mubr.msk.f32.vlgmr.msra.gmra.mrb[0].mxu1 %vm273_vm3, %v2587_v17  ;;  %2313 = vmatpush3.bf16.msk.msra.mxu0 %vm2523_vm2, %v2576_v15 }
  0x36   : > { %2331 = vmatpush3.bf16.msk.msra.mxu1 %vm2523_vm2, %v2576_v15  ;;  %2163 = vmatprep.mubr.msk.f32.mxu0 %vm273_vm3, %v2594_v18 }
  0x37   : > { %2247 = vmatprep.mubr.msk.f32.mxu1 %vm273_vm3, %v2597_v19 }
  0x38   : > { %2164 = vmatmul.mubr.msk.f32.gmra.mrb[2].mxu0 %vm273_vm3, %v2613_v20 }
  0x39   : > { %2248 = vmatmul.mubr.msk.f32.gmra.mrb[2].mxu1 %vm273_vm3, %v2616_v21  ;;  %2166 = vmatprep.mubr.msk.f32.mxu0 %vm273_vm3, %v2619_v22 }
  0x3a   : > { %2250 = vmatprep.mubr.msk.f32.mxu1 %vm273_vm3, %v2622_v23 }
  0x3c   : > { %2167 = vmatmul.mubr.msk.f32.gmra.mrb[4].mxu0 %vm273_vm3, %v2633_v24 }
  0x3d   : > { %2251 = vmatmul.mubr.msk.f32.gmra.mrb[4].mxu1 %vm273_vm3, %v2636_v25  ;;  %2169 = vmatprep.mubr.msk.f32.mxu0 %vm273_vm3, %v2639_v26 }
  0x3e   : > { %2253 = vmatprep.mubr.msk.f32.mxu1 %vm273_vm3, %v2642_v27 }
  0x40   : > { %2170 = vmatmul.mubr.msk.f32.gmra.mrb[6].mxu0 %vm273_vm3, %v2653_v28 }
  0x41   : > { %2254 = vmatmul.mubr.msk.f32.gmra.mrb[6].mxu1 %vm273_vm3, %v2656_v29  ;;  %2172 = vmatprep.mubr.msk.f32.mxu0 %vm273_vm3, %v2659_v30 }
  0x42   : > { %2256 = vmatprep.mubr.msk.f32.mxu1 %vm273_vm3, %v2662_v31 }
  0x44   : > { %2173 = vmatmul.mubr.msk.f32.gmra.mrb[8].mxu0 %vm273_vm3, %v2673_v32 }
  0x45   : > { %2257 = vmatmul.mubr.msk.f32.gmra.mrb[8].mxu1 %vm273_vm3, %v2676_v33  ;;  %2175 = vmatprep.mubr.msk.f32.mxu0 %vm273_vm3, %v2679_v34 }
  0x46   : > { %2259 = vmatprep.mubr.msk.f32.mxu1 %vm273_vm3, %v2682_v35 }
  0x48   : > { %2176 = vmatmul.mubr.msk.f32.gmra.mrb[10].mxu0 %vm273_vm3, %v2693_v36 }
  0x49   : > { %2260 = vmatmul.mubr.msk.f32.gmra.mrb[10].mxu1 %vm273_vm3, %v2696_v37  ;;  %2178 = vmatprep.mubr.msk.f32.mxu0 %vm273_vm3, %v2699_v38 }
  0x4a   : > { %2262 = vmatprep.mubr.msk.f32.mxu1 %vm273_vm3, %v2702_v39 }
  0x4c   : > { %2179 = vmatmul.mubr.msk.f32.gmra.mrb[12].mxu0 %vm273_vm3, %v272_v40 }
  0x4d   : > { %2263 = vmatmul.mubr.msk.f32.gmra.mrb[12].mxu1 %vm273_vm3, %v1917_v41  ;;  %2181 = vmatprep.mubr.msk.f32.mxu0 %vm273_vm3, %v2561_v10 }
  0x4e   : > { %2265 = vmatprep.mubr.msk.f32.mxu1 %vm273_vm3, %v1949_v42 }
  0x50   : > { %2182 = vmatmul.mubr.msk.f32.gmra.mrb[14].mxu0 %vm273_vm3, %v2568_v12 }
  0x51   : > { %2266 = vmatmul.mubr.msk.f32.gmra.mrb[14].mxu1 %vm273_vm3, %v1950_v43  ;;  %2188 = vmatprep.mubr.msk.f32.mxu0 %vm273_vm3, %v2594_v18 }
  0x52   : > { %2272 = vmatprep.mubr.msk.f32.mxu1 %vm273_vm3, %v2597_v19 }
  0x54   : > { %2189 = vmatmul.mubr.msk.f32.vlgmr.msra.gmra.mrb[0].mxu0 %vm273_vm3, %v2613_v20 }
  0x55   : > { %2273 = vmatmul.mubr.msk.f32.vlgmr.msra.gmra.mrb[0].mxu1 %vm273_vm3, %v2616_v21  ;;  %2191 = vmatprep.mubr.msk.f32.mxu0 %vm273_vm3, %v2619_v22 }
  0x56   : > { %2275 = vmatprep.mubr.msk.f32.mxu1 %vm273_vm3, %v2622_v23 }
  0x58   : > { %2192 = vmatmul.mubr.msk.f32.gmra.mrb[2].mxu0 %vm273_vm3, %v2633_v24 }
  0x59   : > { %2276 = vmatmul.mubr.msk.f32.gmra.mrb[2].mxu1 %vm273_vm3, %v2636_v25  ;;  %2194 = vmatprep.mubr.msk.f32.mxu0 %vm273_vm3, %v2639_v26 }
  0x5a   : > { %2278 = vmatprep.mubr.msk.f32.mxu1 %vm273_vm3, %v2642_v27 }
  0x5c   : > { %2195 = vmatmul.mubr.msk.f32.gmra.mrb[4].mxu0 %vm273_vm3, %v2653_v28 }
  0x5d   : > { %2279 = vmatmul.mubr.msk.f32.gmra.mrb[4].mxu1 %vm273_vm3, %v2656_v29  ;;  %2197 = vmatprep.mubr.msk.f32.mxu0 %vm273_vm3, %v2659_v30 }
  0x5e   : > { %2281 = vmatprep.mubr.msk.f32.mxu1 %vm273_vm3, %v2662_v31 }
  0x60   : > { %2198 = vmatmul.mubr.msk.f32.gmra.mrb[6].mxu0 %vm273_vm3, %v2673_v32 }
  0x61   : > { %2282 = vmatmul.mubr.msk.f32.gmra.mrb[6].mxu1 %vm273_vm3, %v2676_v33  ;;  %2200 = vmatprep.mubr.msk.f32.mxu0 %vm273_vm3, %v2679_v34 }
  0x62   : > { %2284 = vmatprep.mubr.msk.f32.mxu1 %vm273_vm3, %v2682_v35 }
  0x64   : > { %2201 = vmatmul.mubr.msk.f32.gmra.mrb[8].mxu0 %vm273_vm3, %v2693_v36 }
  0x65   : > { %2285 = vmatmul.mubr.msk.f32.gmra.mrb[8].mxu1 %vm273_vm3, %v2696_v37  ;;  %2203 = vmatprep.mubr.msk.f32.mxu0 %vm273_vm3, %v2699_v38 }
  0x66   : > { %2287 = vmatprep.mubr.msk.f32.mxu1 %vm273_vm3, %v2702_v39 }
  0x68   : > { %2204 = vmatmul.mubr.msk.f32.gmra.mrb[10].mxu0 %vm273_vm3, %v272_v40 }
  0x69   : > { %2288 = vmatmul.mubr.msk.f32.gmra.mrb[10].mxu1 %vm273_vm3, %v1917_v41  ;;  %2206 = vmatprep.mubr.msk.f32.mxu0 %vm273_vm3, %v2561_v10 }
  0x6a   : > { %2290 = vmatprep.mubr.msk.f32.mxu1 %vm273_vm3, %v1949_v42 }
  0x6c   : > { %2207 = vmatmul.mubr.msk.f32.gmra.mrb[12].mxu0 %vm273_vm3, %v2568_v12 }
  0x6d   : > { %2291 = vmatmul.mubr.msk.f32.gmra.mrb[12].mxu1 %vm273_vm3, %v1950_v43  ;;  %2209 = vmatprep.mubr.msk.f32.mxu0 %vm273_vm3, %v2574_v14 }
  0x6e   : > { %2293 = vmatprep.mubr.msk.f32.mxu1 %vm273_vm3, %v1982_v44 }
  0x70   : > { %2210 = vmatmul.mubr.msk.f32.gmra.mrb[14].mxu0 %vm273_vm3, %v2587_v17 }
  0x71   : > { %2294 = vmatmul.mubr.msk.f32.gmra.mrb[14].mxu1 %vm273_vm3, %v1983_v45 }
 0x127   : > { %v2190_v47 = vpop.f32.mrb[0].mxu0 }
 0x128   : > { %v2274_v48 = vpop.f32.mrb[0].mxu1  ;;  %v2332_v49 = vadd.f32 %v2190_v47, %v2847_v46  ;;  %v852_v51 = vpop.f32.mrb[1].mxu0 }
 0x129   : > { %v2348_v50 = vadd.f32 %v2274_v48, %v2847_v46  ;;  %v1551_v52 = vpop.f32.mrb[1].mxu1  ;;  %v2333_v53 = vadd.f32 %v2847_v46, %v852_v51 }
 0x12a   : > { %v2349_v54 = vadd.f32 %v2847_v46, %v1551_v52  ;;  %948 = vst [vmem:[%s2852_s10 + $0x8] sm:$0xff] %v2332_v49 }
 0x12b   : > { %2002 = vst [vmem:[%s2852_s10 + $0x88] sm:$0xff] %v2348_v50  ;;  %947 = vst [vmem:[%s2852_s10] sm:$0xff] %v2333_v53  ;;  %v2193_v55 = vpop.f32.mrb[2].mxu0 }
 0x12c   : > { %2001 = vst [vmem:[%s2852_s10 + $0x80] sm:$0xff] %v2349_v54  ;;  %v2277_v56 = vpop.f32.mrb[2].mxu1  ;;  %v2334_v57 = vadd.f32 %v2193_v55, %v2847_v46  ;;  %v862_v59 = vpop.f32.mrb[3].mxu0 }
 0x12d   : > { %v2350_v58 = vadd.f32 %v2277_v56, %v2847_v46  ;;  %v1561_v60 = vpop.f32.mrb[3].mxu1  ;;  %v2335_v61 = vadd.f32 %v2847_v46, %v862_v59 }
 0x12e   : > { %v2351_v62 = vadd.f32 %v2847_v46, %v1561_v60  ;;  %950 = vst [vmem:[%s2852_s10 + $0x18] sm:$0xff] %v2334_v57 }
 0x12f   : > { %2004 = vst [vmem:[%s2852_s10 + $0x98] sm:$0xff] %v2350_v58  ;;  %949 = vst [vmem:[%s2852_s10 + $0x10] sm:$0xff] %v2335_v61  ;;  %v2196_v63 = vpop.f32.mrb[4].mxu0 }
 0x130   : > { %2003 = vst [vmem:[%s2852_s10 + $0x90] sm:$0xff] %v2351_v62  ;;  %v2280_v0 = vpop.f32.mrb[4].mxu1  ;;  %v2336_v1 = vadd.f32 %v2196_v63, %v2847_v46  ;;  %v872_v3 = vpop.f32.mrb[5].mxu0 }
 0x131   : > { %v2352_v2 = vadd.f32 %v2280_v0, %v2847_v46  ;;  %v1571_v4 = vpop.f32.mrb[5].mxu1  ;;  %v2337_v5 = vadd.f32 %v2847_v46, %v872_v3 }
 0x132   : > { %v2353_v6 = vadd.f32 %v2847_v46, %v1571_v4  ;;  %952 = vst [vmem:[%s2852_s10 + $0x28] sm:$0xff] %v2336_v1 }
 0x133   : > { %2006 = vst [vmem:[%s2852_s10 + $0xa8] sm:$0xff] %v2352_v2  ;;  %951 = vst [vmem:[%s2852_s10 + $0x20] sm:$0xff] %v2337_v5  ;;  %v2199_v7 = vpop.f32.mrb[6].mxu0 }
 0x134   : > { %2005 = vst [vmem:[%s2852_s10 + $0xa0] sm:$0xff] %v2353_v6  ;;  %v2283_v8 = vpop.f32.mrb[6].mxu1  ;;  %v2338_v9 = vadd.f32 %v2199_v7, %v2847_v46  ;;  %v882_v11 = vpop.f32.mrb[7].mxu0 }
 0x135   : > { %v2354_v10 = vadd.f32 %v2283_v8, %v2847_v46  ;;  %v1581_v12 = vpop.f32.mrb[7].mxu1  ;;  %v2339_v13 = vadd.f32 %v2847_v46, %v882_v11 }
 0x136   : > { %v2355_v14 = vadd.f32 %v2847_v46, %v1581_v12  ;;  %954 = vst [vmem:[%s2852_s10 + $0x38] sm:$0xff] %v2338_v9 }
 0x137   : > { %2008 = vst [vmem:[%s2852_s10 + $0xb8] sm:$0xff] %v2354_v10  ;;  %953 = vst [vmem:[%s2852_s10 + $0x30] sm:$0xff] %v2339_v13  ;;  %v2202_v15 = vpop.f32.mrb[8].mxu0 }
 0x138   : > { %2007 = vst [vmem:[%s2852_s10 + $0xb0] sm:$0xff] %v2355_v14  ;;  %v2286_v16 = vpop.f32.mrb[8].mxu1  ;;  %v2340_v17 = vadd.f32 %v2202_v15, %v2847_v46  ;;  %v892_v19 = vpop.f32.mrb[9].mxu0 }
 0x139   : > { %v2356_v18 = vadd.f32 %v2286_v16, %v2847_v46  ;;  %v1591_v20 = vpop.f32.mrb[9].mxu1  ;;  %v2341_v21 = vadd.f32 %v2847_v46, %v892_v19 }
 0x13a   : > { %v2357_v22 = vadd.f32 %v2847_v46, %v1591_v20  ;;  %956 = vst [vmem:[%s2852_s10 + $0x48] sm:$0xff] %v2340_v17 }
 0x13b   : > { %2010 = vst [vmem:[%s2852_s10 + $0xc8] sm:$0xff] %v2356_v18  ;;  %955 = vst [vmem:[%s2852_s10 + $0x40] sm:$0xff] %v2341_v21  ;;  %v2205_v23 = vpop.f32.mrb[10].mxu0 }
 0x13c   : > { %2009 = vst [vmem:[%s2852_s10 + $0xc0] sm:$0xff] %v2357_v22  ;;  %v2289_v24 = vpop.f32.mrb[10].mxu1  ;;  %v2342_v25 = vadd.f32 %v2205_v23, %v2847_v46  ;;  %v902_v27 = vpop.f32.mrb[11].mxu0 }
 0x13d   : > { %v2358_v26 = vadd.f32 %v2289_v24, %v2847_v46  ;;  %v1601_v28 = vpop.f32.mrb[11].mxu1  ;;  %v2343_v29 = vadd.f32 %v2847_v46, %v902_v27 }
 0x13e   : > { %v2359_v30 = vadd.f32 %v2847_v46, %v1601_v28  ;;  %958 = vst [vmem:[%s2852_s10 + $0x58] sm:$0xff] %v2342_v25 }
 0x13f   : > { %2012 = vst [vmem:[%s2852_s10 + $0xd8] sm:$0xff] %v2358_v26  ;;  %957 = vst [vmem:[%s2852_s10 + $0x50] sm:$0xff] %v2343_v29  ;;  %v2208_v31 = vpop.f32.mrb[12].mxu0 }
 0x140   : > { %2011 = vst [vmem:[%s2852_s10 + $0xd0] sm:$0xff] %v2359_v30  ;;  %v2292_v32 = vpop.f32.mrb[12].mxu1  ;;  %v2344_v33 = vadd.f32 %v2208_v31, %v2847_v46  ;;  %v912_v35 = vpop.f32.mrb[13].mxu0 }
 0x141   : > { %v2360_v34 = vadd.f32 %v2292_v32, %v2847_v46  ;;  %v1611_v36 = vpop.f32.mrb[13].mxu1  ;;  %v2345_v37 = vadd.f32 %v2847_v46, %v912_v35 }
 0x142   : > { %v2361_v38 = vadd.f32 %v2847_v46, %v1611_v36  ;;  %960 = vst [vmem:[%s2852_s10 + $0x68] sm:$0xff] %v2344_v33 }
 0x143   : > { %2014 = vst [vmem:[%s2852_s10 + $0xe8] sm:$0xff] %v2360_v34  ;;  %959 = vst [vmem:[%s2852_s10 + $0x60] sm:$0xff] %v2345_v37  ;;  %v2211_v39 = vpop.f32.mrb[14].mxu0 }
 0x144   : > { %2013 = vst [vmem:[%s2852_s10 + $0xe0] sm:$0xff] %v2361_v38  ;;  %v2295_v40 = vpop.f32.mrb[14].mxu1  ;;  %v2346_v41 = vadd.f32 %v2211_v39, %v2847_v46  ;;  %v922_v43 = vpop.f32.mrb[15].mxu0 }
 0x145   : > { %v2362_v42 = vadd.f32 %v2295_v40, %v2847_v46  ;;  %v1621_v44 = vpop.f32.mrb[15].mxu1  ;;  %v2347_v45 = vadd.f32 %v2847_v46, %v922_v43 }
 0x146   : > { %v2363_v47 = vadd.f32 %v2847_v46, %v1621_v44  ;;  %962 = vst [vmem:[%s2852_s10 + $0x78] sm:$0xff] %v2346_v41 }
 0x147   : > { %2016 = vst [vmem:[%s2852_s10 + $0xf8] sm:$0xff] %v2362_v42  ;;  %961 = vst [vmem:[%s2852_s10 + $0x70] sm:$0xff] %v2347_v45 }
 0x148   : > { %2015 = vst [vmem:[%s2852_s10 + $0xf0] sm:$0xff] %v2363_v47 }
 0x149 PF: > { %s13_s14 = sadd.s32 1, %s2476_s14   ;;  %s2933_s12 = smov %s2472_s13 }
 0x14a   : > { %p10_p5 = scmp.ge.s32.totalorder %s13_s14, 4   ;;  %s2934_s13 = smov %s2936_s15 }
 0x14c   :  { %12 = sbr.rel (!%p10_p5) target bundleno = 2 (0x2), region = 77 }

</bundles_post_ra>
